<compile_context>
chip_gen: v6e
topology: v6e:2x2x1
jax: 0.10.0
libtpu: 0.0.40
codegen_flags: <defaults>
</compile_context>

<pallas_src>
import functools

import numpy as np
import jax
import jax.numpy as jnp
from jax.experimental import pallas as pl
from jax.experimental.pallas import tpu as pltpu


# ---------------------------------------------------------------------------
# Host-side (numpy) construction of the composed interpolation matrices.
# ---------------------------------------------------------------------------

def _interp_matrix_np(out_size: int, in_size: int) -> np.ndarray:
    """(out_size, in_size) linear-interpolation matrix matching
    torch.nn.Upsample(mode='trilinear'/'linear' per axis, align_corners=False)."""
    if out_size == in_size:
        return np.eye(out_size, dtype=np.float64)       # src = i exactly
    w = np.zeros((out_size, in_size), dtype=np.float64)
    scale = in_size / out_size
    for i in range(out_size):
        src = max((i + 0.5) * scale - 0.5, 0.0)         # PyTorch clamps negatives
        i0 = min(int(np.floor(src)), in_size - 1)
        i1 = min(i0 + 1, in_size - 1)
        frac = min(max(src - i0, 0.0), 1.0)
        w[i, i0] += 1.0 - frac
        w[i, i1] += frac
    return w


def _composed_interp_np(full_size: int, bottleneck: int, n: int) -> np.ndarray:
    """(full_size, bottleneck) matrix implementing the whole decoder along one
    spatial axis: (n-1) scale-2 upsamples followed by a resize to full_size."""
    m = np.eye(bottleneck, dtype=np.float64)
    cur = bottleneck
    for _ in range(n - 1):
        m = _interp_matrix_np(cur * 2, cur) @ m
        cur *= 2
    return _interp_matrix_np(full_size, cur) @ m


def _selection_np(full_size: int, stride: int) -> np.ndarray:
    """(ceil(full/stride), full) matrix implementing the kernel_size=1,
    stride-`stride` average pool (i.e. x[::stride])."""
    sub = len(range(0, full_size, stride))
    sel = np.zeros((sub, full_size), dtype=np.float64)
    sel[np.arange(sub), np.arange(sub) * stride] = 1.0
    return sel


@functools.lru_cache(maxsize=None)
def _kron_matrix_np(h: int, w: int, n: int, pad_cols: int) -> np.ndarray:
    """Cached (h*w, pad_cols) matrix: encoder subsample + full decoder, so that
    out_flat = x_flat @ M.  Columns beyond h*w are zero (lane-dense padding)."""
    stride = 2 ** n
    hb = len(range(0, h, stride))
    wb = len(range(0, w, stride))
    wh_full = _composed_interp_np(h, hb, n) @ _selection_np(h, stride)   # (h, h)
    ww_full = _composed_interp_np(w, wb, n) @ _selection_np(w, stride)   # (w, w)
    mt = np.kron(wh_full, ww_full).T                                     # (h*w, h*w)
    if pad_cols > mt.shape[1]:
        mt = np.pad(mt, ((0, 0), (0, pad_cols - mt.shape[1])))
    return mt


@functools.lru_cache(maxsize=None)
def _separable_matrices_np(h: int, w: int, n: int, w_pad: int):
    """Cached (Hb, H) and (Wb, W_pad) decoder matrices (transposed, so the
    kernel's flat matmuls need no in-kernel weight transposes)."""
    stride = 2 ** n
    hb = len(range(0, h, stride))
    wb = len(range(0, w, stride))
    whT = _composed_interp_np(h, hb, n).T                # (Hb, H)
    wwT = _composed_interp_np(w, wb, n).T                # (Wb, W)
    if w_pad > w:
        wwT = np.pad(wwT, ((0, 0), (0, w_pad - w)))      # zero cols -> lane-dense
    return whT, wwT


# ---------------------------------------------------------------------------
# Pallas kernels.
# ---------------------------------------------------------------------------

def _kron_kernel(mt_ref, x_ref, o_ref):
    # mt_ref: (HW_in, HW_out_pad)  resident weights (encoder folded in, bf16)
    # x_ref : (TS, HW_in)          TS full-resolution slices, lane-flattened
    # o_ref : (TS, HW_out_pad)     lane-dense (multiple-of-128) output columns
    x = x_ref[...].astype(mt_ref.dtype)
    o_ref[...] = jnp.dot(
        x, mt_ref[...], preferred_element_type=jnp.float32).astype(o_ref.dtype)


def _separable_kernel(whT_ref, wwT_ref, x_ref, o_ref):
    # Fallback for large H*W.  Two FLAT 2-D MXU matmuls (no batched dot_general),
    # one minor-dims transpose (rides the otherwise-idle XLU slot), lane-dense
    # output columns (W_pad is a multiple of 128 -> unmasked vst).
    #   whT_ref: (Hb, H)       resident H-resize weights
    #   wwT_ref: (Wb, W_pad)   resident W-resize weights, zero-padded columns
    #   x_ref  : (TS, Wb, Hb)  bottleneck slices, pre-transposed by the wrapper
    #   o_ref  : (TS, H, W_pad)
    ts, wb, hb = x_ref.shape
    h = whT_ref.shape[1]
    w_pad = wwT_ref.shape[1]
    x = x_ref[...].astype(whT_ref.dtype)
    # H resize: flat matmul, M = TS*Wb, K = Hb, N = H.
    u = jnp.dot(x.reshape(ts * wb, hb), whT_ref[...],
                preferred_element_type=jnp.float32)                  # (TS*Wb, H)
    # Single in-kernel transpose of the minor dims to line Wb up as next K.
    u = jnp.swapaxes(u.reshape(ts, wb, h), 1, 2)                     # (TS, H, Wb)
    u = u.reshape(ts * h, wb).astype(wwT_ref.dtype)
    # W resize: flat matmul, M = TS*H, K = Wb, N = W_pad (lane-dense).
    v = jnp.dot(u, wwT_ref[...], preferred_element_type=jnp.float32)  # (TS*H, W_pad)
    o_ref[...] = v.reshape(ts, h, w_pad).astype(o_ref.dtype)


# ---------------------------------------------------------------------------
# Tiling helpers.
# ---------------------------------------------------------------------------

_KRON_MAX_ELEMS_BF16 = 1024   # use the kron path when H*W <= this (bf16 weights)
_KRON_MAX_ELEMS_F32 = 256     # v5e f32 MXU: stride^2-inflated kron FLOPs lose sooner


def _round_up(x: int, m: int) -> int:
    return (x + m - 1) // m * m


def _cdiv(a: int, b: int) -> int:
    return -(-a // b)


@functools.lru_cache(maxsize=None)
def _vmem_limits():
    """(vmem_limit_bytes, tiling budget) chosen from the chip's physical VMEM:
    v5e/v6e have 128 MiB (use 96/56 MiB), v7x has 64 MiB (use 32/20 MiB)."""
    try:
        cap = int(pltpu.get_tpu_info().vmem_capacity_bytes)
    except Exception:
        cap = 64 * 1024 * 1024  # conservative (v7x-sized) fallback
    if cap >= 96 * 1024 * 1024:
        return 96 * 1024 * 1024, 56 * 1024 * 1024
    return 32 * 1024 * 1024, 20 * 1024 * 1024


def _pick_block_slices(s_total: int, bytes_per_slice: int, fixed_bytes: int,
                       vmem_budget: int) -> int:
    """Slices per grid step: sublane-aligned (multiple of 8), sized from the VMEM
    budget, preferring an EVEN number of grid steps so v7x's two TensorCores get
    balanced work under dimension_semantics=('parallel',)."""
    s_pad8 = _round_up(max(s_total, 1), 8)
    avail = max(vmem_budget - fixed_bytes, 8 * bytes_per_slice)
    ts_cap = max(8, min(avail // max(bytes_per_slice, 1), 512, s_pad8))
    ts_cap = max(8, (ts_cap // 8) * 8)
    steps = _cdiv(s_pad8, ts_cap)
    if steps % 2 == 0:
        return int(ts_cap)
    # Odd step count unbalances the two TCs; try the tile that gives the next
    # even step count with minimal padding (e.g. 1 step of 64 -> 2 steps of 32).
    ts_even = max(8, _round_up(_cdiv(s_pad8, steps + 1), 8))
    if _cdiv(s_pad8, ts_even) % 2 == 0:
        return int(ts_even)
    return int(ts_cap)


# ---------------------------------------------------------------------------
# pallas_call wrappers.
# ---------------------------------------------------------------------------

def _fused_kron_resize(x_flat, mt, ts, vmem_limit):
    """x_flat: (S, HW_in) -> (S, HW_out_pad) via one lane-dense matmul per block."""
    s_total, hw_in = x_flat.shape
    hw_out_pad = mt.shape[1]
    s_pad = _round_up(s_total, ts)
    if s_pad != s_total:
        x_flat = jnp.pad(x_flat, ((0, s_pad - s_total), (0, 0)))
    out = pl.pallas_call(
        _kron_kernel,
        out_shape=jax.ShapeDtypeStruct((s_pad, hw_out_pad), x_flat.dtype),
        grid_spec=pltpu.PrefetchScalarGridSpec(
            num_scalar_prefetch=0,
            grid=(s_pad // ts,),
            in_specs=[
                pl.BlockSpec((hw_in, hw_out_pad), lambda s: (0, 0)),  # resident weights
                pl.BlockSpec((ts, hw_in), lambda s: (s, 0)),
            ],
            out_specs=pl.BlockSpec((ts, hw_out_pad), lambda s: (s, 0)),
        ),
        compiler_params=pltpu.CompilerParams(
            dimension_semantics=("parallel",),
            vmem_limit_bytes=vmem_limit),
    )(mt, x_flat)
    return out[:s_total]


def _fused_separable_resize(x_t, whT, wwT, ts, h_out, vmem_limit):
    """x_t: (S, Wb, Hb) -> (S, H, W_pad) via two flat matmuls per slice-block."""
    s_total, wb, hb = x_t.shape
    w_pad = wwT.shape[1]
    s_pad = _round_up(s_total, ts)
    if s_pad != s_total:
        x_t = jnp.pad(x_t, ((0, s_pad - s_total), (0, 0), (0, 0)))
    out = pl.pallas_call(
        _separable_kernel,
        out_shape=jax.ShapeDtypeStruct((s_pad, h_out, w_pad), x_t.dtype),
        grid_spec=pltpu.PrefetchScalarGridSpec(
            num_scalar_prefetch=0,
            grid=(s_pad // ts,),
            in_specs=[
                pl.BlockSpec((hb, h_out), lambda s: (0, 0)),      # resident weights
                pl.BlockSpec((wb, w_pad), lambda s: (0, 0)),      # resident weights
                pl.BlockSpec((ts, wb, hb), lambda s: (s, 0, 0)),
            ],
            out_specs=pl.BlockSpec((ts, h_out, w_pad), lambda s: (s, 0, 0)),
        ),
        compiler_params=pltpu.CompilerParams(
            dimension_semantics=("parallel",),
            vmem_limit_bytes=vmem_limit),
    )(whT, wwT, x_t)
    return out


# ---------------------------------------------------------------------------
# Forward pass.
# ---------------------------------------------------------------------------

@functools.partial(jax.jit, static_argnames=("n", "use_bf16"))
def no_conv_ae_forward(x: jnp.ndarray, n: int = 2, *,
                       use_bf16: bool = True) -> jnp.ndarray:
    """NoConvAE(n, pooling_dim='spatial', pooling_mode='Avg').forward(x).

    x: (N, D, H, W) -> (N, D, H, W).  Default runs the matmuls with bf16
    operands (f32 accumulation): ~3-4x MXU rate, ~1e-3 relative error.
    Set use_bf16=False for full f32 operands.
    """
    N, D, H, W = x.shape
    S = N * D
    stride = 2 ** n
    hb = len(range(0, H, stride))
    wb = len(range(0, W, stride))
    compute_dtype = jnp.bfloat16 if use_bf16 else jnp.float32
    wsize = 2 if use_bf16 else 4
    itm = x.dtype.itemsize
    vmem_limit, vmem_budget = _vmem_limits()
    kron_cap = _KRON_MAX_ELEMS_BF16 if use_bf16 else _KRON_MAX_ELEMS_F32

    if H * W <= kron_cap:
        # Small spatial sizes: fold the encoder's strided subsample into the
        # matrices and collapse both separable matmuls into one lane-dense
        # Kronecker matmul covering encoder + all decoder stages.
        hw_in = H * W
        hw_out = H * W
        hw_out_pad = _round_up(hw_out, 128)               # unmasked stores always
        mt = jnp.asarray(_kron_matrix_np(H, W, n, hw_out_pad), dtype=compute_dtype)
        x_flat = x.reshape(S, hw_in)
        bytes_per_slice = 2 * (hw_in + hw_out_pad) * itm + 4 * hw_out_pad
        fixed = 2 * hw_in * hw_out_pad * wsize            # double-buffered weights
        ts = _pick_block_slices(S, bytes_per_slice, fixed, vmem_budget)
        out = _fused_kron_resize(x_flat, mt, ts, vmem_limit)
        return out[:, :hw_out].reshape(N, D, H, W)

    # Large spatial sizes: the Kronecker matrix would be too big, so do the
    # (glue) strided subsample + minor-dims transpose in XLA on the tiny
    # bottleneck and run one pallas_call with the composed separable matrices.
    w_pad = _round_up(W, 128)
    whT_np, wwT_np = _separable_matrices_np(H, W, n, w_pad)
    whT = jnp.asarray(whT_np, dtype=compute_dtype)        # (Hb, H)
    wwT = jnp.asarray(wwT_np, dtype=compute_dtype)        # (Wb, W_pad)
    x_t = jnp.swapaxes(x[:, :, ::stride, ::stride], 2, 3).reshape(S, wb, hb)
    bytes_per_slice = (2 * wb * hb * itm + 2 * H * w_pad * itm
                       + 4 * (wb * H + H * w_pad))
    fixed = 2 * (hb * H + wb * w_pad) * wsize
    ts = _pick_block_slices(S, bytes_per_slice, fixed, vmem_budget)
    out = _fused_separable_resize(x_t, whT, wwT, ts, H, vmem_limit)
    return out[:S, :, :W].reshape(N, D, H, W)


# ---------------------------------------------------------------------------
# Pure-JAX stage-by-stage reference (sanity check against the fused kernel).
# ---------------------------------------------------------------------------

def _reference_forward(x: jnp.ndarray, n: int) -> jnp.ndarray:
    N, D, H, W = x.shape
    stride = 2 ** n
    y = x[:, :, ::stride, ::stride].astype(jnp.float32)
    h, w = y.shape[-2], y.shape[-1]
    targets = [(h * 2 ** (i + 1), w * 2 ** (i + 1)) for i in range(n - 1)] + [(H, W)]
    for ho, wo in targets:
        wh = jnp.asarray(_interp_matrix_np(ho, h), jnp.float32)
        ww = jnp.asarray(_interp_matrix_np(wo, w), jnp.float32)
        y = jnp.einsum('oh,ndhw,pw->ndop', wh, y, ww)
        h, w = ho, wo
    return y.astype(x.dtype)


if __name__ == "__main__":
    key = jax.random.PRNGKey(0)
    # Input implied by forward(): (N, D, H, W); channel dim is added internally.
    x = jax.random.normal(key, (2, 4, 16, 16), dtype=jnp.float32)

    out = jax.block_until_ready(no_conv_ae_forward(x, n=2))
    assert out.shape == x.shape, (out.shape, x.shape)
    assert bool(jnp.all(jnp.isfinite(out)))

    ref = jax.block_until_ready(_reference_forward(x, n=2))
    assert bool(jnp.allclose(out, ref, atol=5e-2, rtol=5e-2)), "mismatch vs reference"

    # Second call hits the jit cache and the lru-cached composed matrices
    # (no per-call numpy kron / weight re-upload).
    out2 = jax.block_until_ready(no_conv_ae_forward(x, n=2))
    assert bool(jnp.allclose(out, out2))

    print("KERNEL_OK")
</pallas_src>

<mosaic_0001>
module attributes {stable_mosaic.version = 11 : i64} {
  func.func @_kron_kernel(%arg0: i32, %arg1: memref<256x256xbf16, #tpu.memory_space<vmem>>, %arg2: memref<8x256xf32, #tpu.memory_space<vmem>>, %arg3: memref<8x256xf32, #tpu.memory_space<vmem>>) attributes {dimension_semantics = [#tpu.dimension_semantics<parallel>], iteration_bounds = array<i64: 1>, scalar_prefetch = 0 : i64, scratch_operands = 0 : i64, tpu.core_type = #tpu.core_type<tc>, window_params = [{pipeline_mode = #tpu.pipeline_mode<synchronous>, transform_indices = @transform_0, window_bounds = array<i64: 256, 256>}, {transform_indices = @transform_1, window_bounds = array<i64: 8, 256>}, {transform_indices = @transform_2, window_bounds = array<i64: 8, 256>}]} {
    %c0 = arith.constant 0 : index
    %c0_0 = arith.constant 0 : index
    %0 = vector.load %arg2[%c0, %c0_0] : memref<8x256xf32, #tpu.memory_space<vmem>>, vector<8x256xf32>
    %1 = arith.truncf %0 : vector<8x256xf32> to vector<8x256xbf16>
    %c0_1 = arith.constant 0 : index
    %c0_2 = arith.constant 0 : index
    %2 = vector.load %arg1[%c0_1, %c0_2] : memref<256x256xbf16, #tpu.memory_space<vmem>>, vector<256x256xbf16>
    %cst = arith.constant dense<0.000000e+00> : vector<8x256xf32>
    %3 = tpu.matmul %1, %2, %cst {dimension_numbers = #tpu.dot_dimension_numbers<[1], [0], [0], [1], [0, 0, 1, 1], [], []>} : vector<8x256xbf16>, vector<256x256xbf16>, vector<8x256xf32> -> vector<8x256xf32>
    %c0_3 = arith.constant 0 : index
    %c0_4 = arith.constant 0 : index
    %4 = vector.load %arg3[%c0_3, %c0_4] : memref<8x256xf32, #tpu.memory_space<vmem>>, vector<8x256xf32>
    tpu.vector_store %arg3[%c0_3, %c0_4], %3 {strides = array<i32>} : memref<8x256xf32, #tpu.memory_space<vmem>>, vector<8x256xf32>,
    return
  }
  func.func @transform_0(%arg0: i32) -> (i32, i32) {
    %c0_i32 = arith.constant 0 : i32
    %c0_i32_0 = arith.constant 0 : i32
    %c0_i32_1 = arith.constant 0 : i32
    return %c0_i32, %c0_i32_0 : i32, i32
  }
  func.func @transform_1(%arg0: i32) -> (i32, i32) {
    %c0_i32 = arith.constant 0 : i32
    %c0_i32_0 = arith.constant 0 : i32
    return %arg0, %c0_i32 : i32, i32
  }
  func.func @transform_2(%arg0: i32) -> (i32, i32) {
    %c0_i32 = arith.constant 0 : i32
    %c0_i32_0 = arith.constant 0 : i32
    return %arg0, %c0_i32 : i32, i32
  }
}

</mosaic_0001>

<bundles_post_ra>
// kernel: no_conv_ae_forward.1
= control target key start
LH: loop header
LB: loop body
LE: loop exit
PB: predicated region body
PF: predicated region fallthrough
CT: control target
= control target key end

     0   :  { %7 = vsyncpa [#allocation3], 0  ;;  %s374_s9 = smov [#allocation2]   ;;  %s407_s0 = inlined_call_operand.hbm [shape: bf16[256,256], index: 0, kind: input, shape index: {}]   ;;  %s408_s1 = inlined_call_operand.vmem [shape: f32[8,256], index: 1, kind: input, shape index: {}]   ;;  %s409_s2 = inlined_call_operand.vmem [shape: f32[8,256], index: 2, kind: output, shape index: {}]  }
   0x1   :  { %s13_s10 = sshll.u32 %s374_s9, 4  ;;  %s14_s10 = int_to_ptr.vmem [resolvable:$true] %s13_s10 }
   0x2   :  { %s360_s11 = scalar_lea.vmem %s14_s10, 4096  ;;  %p365_p1 = scmp.lt.s32.totalorder %s14_s10, %s14_s10 }
   0x3   :  { %p361_p0 = scmp.ne.s32.totalorder %s14_s10, %s360_s11  ;;  %p366_p2 = scmp.lt.s32.totalorder %s360_s11, %s360_s11 }
   0x5   :  { %p367_p3 = por %p366_p2, %p365_p1 }
   0x7   :  { %p368_p4 = pnand %p367_p3, %p361_p0 }
   0x9   :  { %371 = shalt.err (!%p368_p4)
}
   0xa   :  { %s375_s12 = smov 128   ;;  %s376_s13 = smov 8  }
   0xb   :  { %19 = dma.hbm_to_vmem [thread:$0]  %s407_s0, 4096, %s14_s10, [#allocation3], %s375_s12, %s375_s12, %s376_s13  }
   0xc   :  { %372 = dma.done.wait [#allocation3], 4096  }
   0xd   :  { %373 = vsyncadd [#allocation3], 4294963200  ;;  %v304_v0 = vld [vmem:[#allocation2 + $0x74] ss:$8 sps:$4 sm:$0xff]   ;;  %v306_v1 = vld [vmem:[#allocation2 + $0x70] ss:$8 sps:$4 sm:$0xff]  }
   0xe   :  { %221 = vmatprep.subr.bf16.mxu0 %v304_v0  ;;  %v307_v2 = vld [vmem:[#allocation2 + $0x64] ss:$8 sps:$4 sm:$0xff]   ;;  %v309_v3 = vld [vmem:[#allocation2 + $0x60] ss:$8 sps:$4 sm:$0xff]   ;;  %v310_v4 = vld [vmem:[#allocation2 + $0x54] ss:$8 sps:$4 sm:$0xff]  }
   0xf   :  { %222 = vmatpush1.bf16.msra.mxu0 %v306_v1  ;;  %v312_v5 = vld [vmem:[#allocation2 + $0x50] ss:$8 sps:$4 sm:$0xff]   ;;  %v313_v6 = vld [vmem:[#allocation2 + $0x44] ss:$8 sps:$4 sm:$0xff]   ;;  %v315_v7 = vld [vmem:[#allocation2 + $0x40] ss:$8 sps:$4 sm:$0xff]  }
  0x10   :  { %223 = vmatprep.subr.bf16.mxu0 %v307_v2  ;;  %v316_v8 = vld [vmem:[#allocation2 + $0x34] ss:$8 sps:$4 sm:$0xff]   ;;  %v318_v9 = vld [vmem:[#allocation2 + $0x30] ss:$8 sps:$4 sm:$0xff]   ;;  %v319_v10 = vld [vmem:[#allocation2 + $0x24] ss:$8 sps:$4 sm:$0xff]  }
  0x11   :  { %v321_v11 = vld [vmem:[#allocation2 + $0x20] ss:$8 sps:$4 sm:$0xff]   ;;  %v322_v12 = vld [vmem:[#allocation2 + $0x14] ss:$8 sps:$4 sm:$0xff]   ;;  %v324_v15 = vld [vmem:[#allocation2 + $0x10] ss:$8 sps:$4 sm:$0xff]  }
  0x12   :  { %v26_v13 = vld [vmem:[%s408_s1 + $0x8] sm:$0xff]  ;;  %v328_v18 = vld [vmem:[#allocation2 + $0xf4] ss:$8 sps:$4 sm:$0xff]   ;;  %v330_v19 = vld [vmem:[#allocation2 + $0xf0] ss:$8 sps:$4 sm:$0xff]  }
  0x13   :  { %224 = vmatpush1.bf16.msra.mxu0 %v309_v3  ;;  %v28_v14 = vpack.c.bf16 %v26_v13, %v26_v13  ;;  %v325_v16 = vld [vmem:[#allocation2 + $0x4] ss:$8 sps:$4 sm:$0xff]   ;;  %v327_v17 = vld [vmem:[#allocation2] ss:$8 sps:$4 sm:$0xff]   ;;  %v334_v22 = vld [vmem:[#allocation2 + $0xd4] ss:$8 sps:$4 sm:$0xff]  }
  0x14   :  { %225 = vmatprep.subr.bf16.mxu0 %v310_v4  ;;  %v331_v20 = vld [vmem:[#allocation2 + $0xe4] ss:$8 sps:$4 sm:$0xff]   ;;  %v333_v21 = vld [vmem:[#allocation2 + $0xe0] ss:$8 sps:$4 sm:$0xff]   ;;  %v336_v23 = vld [vmem:[#allocation2 + $0xd0] ss:$8 sps:$4 sm:$0xff]  }
  0x15   :  { %253 = vmatprep.mubr.bf16.mxu0 %v28_v14  ;;  %v337_v24 = vld [vmem:[#allocation2 + $0xc4] ss:$8 sps:$4 sm:$0xff]   ;;  %v339_v25 = vld [vmem:[#allocation2 + $0xc0] ss:$8 sps:$4 sm:$0xff]   ;;  %v340_v26 = vld [vmem:[#allocation2 + $0xb4] ss:$8 sps:$4 sm:$0xff]  }
  0x16   :  { %v342_v27 = vld [vmem:[#allocation2 + $0xb0] ss:$8 sps:$4 sm:$0xff]   ;;  %v343_v28 = vld [vmem:[#allocation2 + $0xa4] ss:$8 sps:$4 sm:$0xff]   ;;  %v345_v29 = vld [vmem:[#allocation2 + $0xa0] ss:$8 sps:$4 sm:$0xff]  }
  0x17   :  { %226 = vmatpush1.bf16.msra.mxu0 %v312_v5  ;;  %v346_v30 = vld [vmem:[#allocation2 + $0x94] ss:$8 sps:$4 sm:$0xff]   ;;  %v348_v31 = vld [vmem:[#allocation2 + $0x90] ss:$8 sps:$4 sm:$0xff]   ;;  %v349_v32 = vld [vmem:[#allocation2 + $0x84] ss:$8 sps:$4 sm:$0xff]  }
  0x18   :  { %227 = vmatprep.subr.bf16.mxu0 %v313_v6  ;;  %v351_v33 = vld [vmem:[#allocation2 + $0x80] ss:$8 sps:$4 sm:$0xff]  }
  0x19   :  { %v25_v34 = vld [vmem:[%s408_s1] sm:$0xff] }
  0x1a   :  { %v27_v35 = vpack.c.bf16 %v25_v34, %v25_v34 }
  0x1b   :  { %228 = vmatpush1.bf16.msra.mxu0 %v315_v7 }
  0x1c   :  { %229 = vmatprep.subr.bf16.mxu0 %v316_v8 }
  0x1f   :  { %230 = vmatpush1.bf16.msra.mxu0 %v318_v9 }
  0x20   :  { %231 = vmatprep.subr.bf16.mxu0 %v319_v10 }
  0x23   :  { %232 = vmatpush1.bf16.msra.mxu0 %v321_v11 }
  0x24   :  { %233 = vmatprep.subr.bf16.mxu0 %v322_v12 }
  0x27   :  { %234 = vmatpush1.bf16.msra.mxu0 %v324_v15 }
  0x28   :  { %235 = vmatprep.subr.bf16.mxu0 %v325_v16 }
  0x2b   :  { %236 = vmatpush1.bf16.msra.mxu0 %v327_v17 }
  0x2c   :  { %237 = vmatprep.subr.bf16.mxu0 %v328_v18 }
  0x2f   :  { %238 = vmatpush2.bf16.msra.mxu0 %v330_v19 }
  0x30   :  { %239 = vmatprep.subr.bf16.mxu0 %v331_v20 }
  0x33   :  { %240 = vmatpush2.bf16.msra.mxu0 %v333_v21 }
  0x34   :  { %241 = vmatprep.subr.bf16.mxu0 %v334_v22 }
  0x37   :  { %242 = vmatpush2.bf16.msra.mxu0 %v336_v23 }
  0x38   :  { %243 = vmatprep.subr.bf16.mxu0 %v337_v24 }
  0x3b   :  { %244 = vmatpush2.bf16.msra.mxu0 %v339_v25 }
  0x3c   :  { %245 = vmatprep.subr.bf16.mxu0 %v340_v26 }
  0x3f   :  { %246 = vmatpush2.bf16.msra.mxu0 %v342_v27 }
  0x40   :  { %247 = vmatprep.subr.bf16.mxu0 %v343_v28 }
  0x43   :  { %248 = vmatpush2.bf16.msra.mxu0 %v345_v29 }
  0x44   :  { %249 = vmatprep.subr.bf16.mxu0 %v346_v30 }
  0x47   :  { %250 = vmatpush2.bf16.msra.mxu0 %v348_v31 }
  0x48   :  { %251 = vmatprep.subr.bf16.mxu0 %v349_v32 }
  0x4b   :  { %252 = vmatpush2.bf16.msra.mxu0 %v351_v33 }
  0x4e   :  { %254 = vmatmul.mubr.bf16.vlgmr.msra.gmra.mxu0 %v27_v35 }
 0x10e   :  { %v255_v36 = vpop.f32.mrf.mxu0 }
 0x10f   :  { %262 = vst [vmem:[%s409_s2] sm:$0xff] %v255_v36 }
 0x110   :  { %v257_v37 = vpop.f32.mrf.mxu0 }
 0x111   :  { %263 = vst [vmem:[%s409_s2 + $0x8] sm:$0xff] %v257_v37 }
 0x112   :  { %v259_v38 = vpop.f32.mrf.mxu0 }
 0x114   :  { %v260_v39 = vpop.f32.mrf.mxu0 }
 0x115   :  { %268 = vsyncpa [#allocation3], 1 }

</bundles_post_ra>
